<compile_context>
chip_gen: v6e
topology: v6e:2x2x1
jax: 0.10.0
libtpu: 0.0.40
codegen_flags: <defaults>
</compile_context>

<pallas_src>
import functools

import jax
import jax.numpy as jnp
from jax.experimental import pallas as pl
from jax.experimental.pallas import tpu as pltpu

PI = 3.141592653589793
RAD2DEG = 180.0 / PI  # fold "180 * x / pi" into one multiply

_LANE_CANDIDATES = (4096, 2048, 1024, 512, 256, 128)


def _rad2deg_kernel(x_ref, o_ref):
    # Pure VPU elementwise.  Compute in f32 (no-op for f32 inputs; for bf16 it
    # avoids rounding the constant to bf16 and sidesteps v5e's lack of native
    # bf16 VPU ops) then cast back to the output dtype.
    x = x_ref[...]
    o_ref[...] = (x.astype(jnp.float32) * RAD2DEG).astype(o_ref.dtype)


@functools.lru_cache(maxsize=1)
def _num_tensorcores_per_chip():
    """2 on v7x (megacore), 1 on v5e/v6e.  Conservative default: 1."""
    try:
        kind = jax.devices()[0].device_kind.lower()
    except Exception:  # pragma: no cover - device query failed
        return 1
    return 2 if ("v7" in kind or "7x" in kind) else 1


def _target_block_bytes(num_tc):
    # ~4 MiB/block on v7x (fast HBM -> per-grid-step overhead matters more),
    # ~2 MiB on v5e/v6e.  4 double-buffers of either size fit every
    # generation's default scoped-VMEM limit.
    return (4 << 20) if num_tc > 1 else (2 << 20)


def _sublane_pack(dtype):
    itemsize = jnp.dtype(dtype).itemsize
    return max(8, 32 // itemsize)


def _pick_lanes(n, pack):
    """Widest lane count dividing n that keeps rows >= pack (dense vregs)."""
    for cand in _LANE_CANDIDATES:
        if n % cand == 0 and (n // cand) >= pack:
            return cand
    # Tiny input: no divisor leaves a full sublane group; use the narrowest
    # lane width (128) to maximize sublane density.
    return 128


def _choose_tile_rows(rows, lanes, itemsize, pack, num_tc, target_bytes):
    """Rows per block.  Multiple of `pack` unless it equals the full extent."""
    # Largest tile that keeps one block under the per-block byte target.
    target = max(pack, (target_bytes // (lanes * itemsize)) // pack * pack)

    if num_tc > 1:
        # v7x: aim for >= 2*num_tc roughly equal blocks so both TensorCores
        # stay busy and pack-rounding imbalance amortizes.
        want_blocks = 2 * num_tc
        balanced = -(-rows // want_blocks)        # cdiv(rows, want_blocks)
        balanced = -(-balanced // pack) * pack    # round up to sublane pack
        tile = max(pack, min(target, balanced))
        if tile >= rows:
            return rows                            # tiny: one full-extent block
        return tile

    # v5e / v6e: single sequential TensorCore -> never split for parallelism.
    if rows <= target:
        return rows                                # one full-extent block
    return target


def _run_rad2deg_2d(x2d):
    """Run the elementwise kernel on a lane-dense 2D slab (rows, lanes)."""
    rows, lanes = x2d.shape
    dtype = x2d.dtype
    itemsize = jnp.dtype(dtype).itemsize
    pack = _sublane_pack(dtype)
    num_tc = _num_tensorcores_per_chip()

    tile_rows = _choose_tile_rows(
        rows, lanes, itemsize, pack, num_tc, _target_block_bytes(num_tc)
    )

    grid = (pl.cdiv(rows, tile_rows),)
    n = rows * lanes
    cost = pl.CostEstimate(flops=n, transcendentals=0, bytes_accessed=2 * n * itemsize)

    return pl.pallas_call(
        _rad2deg_kernel,
        out_shape=jax.ShapeDtypeStruct((rows, lanes), dtype),
        grid_spec=pltpu.PrefetchScalarGridSpec(
            num_scalar_prefetch=0,
            grid=grid,
            in_specs=[pl.BlockSpec((tile_rows, lanes), lambda i: (i, 0))],
            out_specs=pl.BlockSpec((tile_rows, lanes), lambda i: (i, 0)),
        ),
        compiler_params=pltpu.CompilerParams(
            dimension_semantics=("parallel",),
        ),
        cost_estimate=cost,
    )(x2d)


def _run_rad2deg_tiny(x2d):
    """Single full-extent block (no grid) for a tiny (1, rem<128) tail."""
    return pl.pallas_call(
        _rad2deg_kernel,
        out_shape=jax.ShapeDtypeStruct(x2d.shape, x2d.dtype),
    )(x2d)


@jax.jit
def rad2deg(x):
    """Converts angles from radians to degrees. Same shape (and float dtype) as input."""
    orig_shape = x.shape
    # TODO(synk): PyTorch's integer-input path divides by a truncated-PI cast
    # (integer division); here non-float inputs are promoted to float32 instead.
    if not jnp.issubdtype(x.dtype, jnp.floating):
        x = x.astype(jnp.float32)
    n = x.size
    if n == 0:
        return jnp.reshape(x, orig_shape)

    pack = _sublane_pack(x.dtype)
    x_flat = jnp.ravel(x)  # contiguous reshape: no HBM copy under jit

    rem = n % 128
    n_main = n - rem

    if rem == 0:
        # Fast path: zero-copy lane-dense reshape, no pad, no tail.
        lanes = _pick_lanes(n, pack)
        out2d = _run_rad2deg_2d(x_flat.reshape(n // lanes, lanes))
        return out2d.reshape(orig_shape)

    # Ragged path: aligned prefix on the fast path + tiny (<128 elem) tail.
    parts = []
    if n_main:
        lanes = _pick_lanes(n_main, pack)
        main_out = _run_rad2deg_2d(
            x_flat[:n_main].reshape(n_main // lanes, lanes)
        ).reshape(-1)
        parts.append(main_out)
    tail_out = _run_rad2deg_tiny(x_flat[n_main:].reshape(1, rem)).reshape(-1)
    parts.append(tail_out)
    out_flat = parts[0] if len(parts) == 1 else jnp.concatenate(parts)
    return out_flat.reshape(orig_shape)


class RadToDeg:
    """JAX/Pallas equivalent of the PyTorch RadToDeg module (no parameters)."""

    def __init__(self):
        pass

    def __call__(self, x):
        return rad2deg(x)


if __name__ == "__main__":
    key = jax.random.PRNGKey(0)
    keys = jax.random.split(key, 5)
    mod = RadToDeg()

    # Docstring-style example: (1, 3, 3) -> tiny ragged path (tail-only kernel).
    x_small = PI * jax.random.uniform(keys[0], (1, 3, 3), dtype=jnp.float32)
    # NCHW-ish example (fast path, dense (8, 256) slab).
    x_big = PI * jax.random.uniform(keys[1], (2, 4, 16, 16), dtype=jnp.float32)
    # Wider fast path (multi-block on v7x, single block on v5e/v6e).
    x_multi = PI * jax.random.uniform(keys[2], (40, 1024), dtype=jnp.float32)
    # bf16 input (exercises sublane-pack-aware lane selection + f32 compute).
    x_bf16 = (PI * jax.random.uniform(keys[3], (16, 32, 128), dtype=jnp.float32)).astype(
        jnp.bfloat16
    )
    # Large-ish ragged input: aligned prefix + <128-element tail.
    x_ragged = PI * jax.random.uniform(keys[4], (7, 300), dtype=jnp.float32)

    cases = (
        (x_small, 1e-6, 1e-5),
        (x_big, 1e-6, 1e-5),
        (x_multi, 1e-6, 1e-5),
        (x_bf16, 2e-2, 1e-1),
        (x_ragged, 1e-6, 1e-5),
    )
    for x, rtol, atol in cases:
        out = jax.block_until_ready(mod(x))
        ref = (x.astype(jnp.float32) * (180.0 / PI)).astype(x.dtype)
        assert out.shape == x.shape and out.dtype == x.dtype
        assert jnp.allclose(
            out.astype(jnp.float32), ref.astype(jnp.float32), rtol=rtol, atol=atol
        ), f"mismatch for shape {x.shape} dtype {x.dtype}"

    print("KERNEL_OK")
</pallas_src>

<mosaic_0001>
module attributes {stable_mosaic.version = 11 : i64} {
  func.func @_rad2deg_kernel(%arg0: memref<1x9xf32, #tpu.memory_space<vmem>>, %arg1: memref<1x9xf32, #tpu.memory_space<vmem>>) attributes {dimension_semantics = [], scalar_prefetch = 0 : i64, scratch_operands = 0 : i64, tpu.core_type = #tpu.core_type<tc>} {
    %c0 = arith.constant 0 : index
    %c0_0 = arith.constant 0 : index
    %0 = vector.load %arg0[%c0, %c0_0] : memref<1x9xf32, #tpu.memory_space<vmem>>, vector<1x9xf32>
    %cst = arith.constant 57.2957802 : f32
    %1 = vector.broadcast %cst : f32 to vector<1x9xf32>
    %2 = arith.mulf %0, %1 : vector<1x9xf32>
    %c0_1 = arith.constant 0 : index
    %c0_2 = arith.constant 0 : index
    %3 = vector.load %arg1[%c0_1, %c0_2] : memref<1x9xf32, #tpu.memory_space<vmem>>, vector<1x9xf32>
    tpu.vector_store %arg1[%c0_1, %c0_2], %2 {strides = array<i32>} : memref<1x9xf32, #tpu.memory_space<vmem>>, vector<1x9xf32>,
    return
  }
}

</mosaic_0001>

<bundles_post_ra>
// kernel: rad2deg.1
= control target key start
LH: loop header
LB: loop body
LE: loop exit
PB: predicated region body
PF: predicated region fallthrough
CT: control target
= control target key end

     0   :  { %vm10_vm0 = vcmask 65536   ;;  %s32_s0 = inlined_call_operand.vmem [shape: f32[1,9], index: 0, kind: input, shape index: {}]   ;;  %s33_s1 = inlined_call_operand.vmem [shape: f32[1,9], index: 1, kind: output, shape index: {}]  }
   0x1   :  { %v8_v0 = vld [vmem:[%s32_s0] sm:$0x1] }
   0x2   :  { %v9_v1 = vmul.f32 57.29578, %v8_v0 }
   0x4   :  { %11 = vst.msk [vmem:[%s33_s1] sm:$0x1] %vm10_vm0, %v9_v1 }

</bundles_post_ra>
